<compile_context>
chip_gen: v6e
topology: v6e:2x2x1
jax: 0.10.0
libtpu: 0.0.40
codegen_flags: <defaults>
</compile_context>

<pallas_src>
import functools

import jax
import jax.numpy as jnp
from jax.experimental import pallas as pl
from jax.experimental.pallas import tpu as pltpu


def _round_up(a: int, b: int) -> int:
    return ((a + b - 1) // b) * b


def _choose_tm(M: int, Dp: int, Cp: int, budget: int = 10 * 1024 * 1024) -> int:
    """Largest power-of-two row tile (<=512) whose double-buffered footprint fits."""
    weight_bytes = 8 * Dp * Cp          # two bf16 weights, double-buffered
    tm = 512
    while tm > 8:
        # per-tile: x(bf16) + g(f32) + out(f32) + soft(f32) + code(f32), x2 buffers
        tile_bytes = 2 * tm * (6 * Dp + 12 * Cp)
        if weight_bytes + tile_bytes <= budget:
            break
        tm //= 2
    return max(8, min(tm, _round_up(M, 8)))


def codebook_kernel(hard_ref, x_ref, wh_ref, wc_ref, g_ref,
                    out_ref, soft_ref, code_ref, *, inv_tau, c_valid):
    hardness = hard_ref[0]                      # f32 scalar in SMEM

    x = x_ref[...]                              # (TM, Dp) bf16
    wh = wh_ref[...]                            # (Cp, Dp) bf16  (head.weight, (out,in))
    g = g_ref[...]                              # (TM, Cp) f32   gumbel noise

    # logits = x @ head.weight.T  (contract D on both operands -> no transpose copy)
    logits = jax.lax.dot_general(
        x, wh, (((1,), (1,)), ((), ())),
        preferred_element_type=jnp.float32)     # (TM, Cp) f32

    Cp = logits.shape[-1]
    if c_valid < Cp:
        # mask padded codebook columns so they never win the softmax / argmax
        col_mask = jax.lax.broadcasted_iota(jnp.int32, logits.shape, 1)
        logits = jnp.where(col_mask < c_valid, logits, -1e30)

    # one softmax: gumbel noise only contributes when hardness >= 0
    gate = jnp.where(hardness < 0.0, 0.0, 1.0)
    z = (logits + gate * g) * inv_tau
    m = jnp.max(z, axis=-1, keepdims=True)
    e = jnp.exp(z - m)
    denom = jnp.sum(e, axis=-1, keepdims=True)
    # approx=False keeps closer numeric parity with the PyTorch reference.
    soft_code = e * pl.reciprocal(denom, approx=False)   # (TM, Cp) f32

    soft_ref[...] = soft_code.astype(soft_ref.dtype)

    @pl.when(hardness > 0.0)
    def _():
        # straight-through: first-index argmax one-hot, blended with soft code
        col = jax.lax.broadcasted_iota(jnp.int32, soft_code.shape, 1)
        mx = jnp.max(soft_code, axis=-1, keepdims=True)
        idx = jnp.min(jnp.where(soft_code == mx, col, Cp), axis=-1, keepdims=True)
        y_hard = (col == idx).astype(soft_code.dtype)
        # forward value of hardness*hard + (1-hardness)*soft
        code_ref[...] = (soft_code + hardness * (y_hard - soft_code)).astype(code_ref.dtype)

    @pl.when(hardness <= 0.0)
    def _():
        code_ref[...] = soft_code.astype(code_ref.dtype)

    # out = code @ codebook.weight.T  (contract C on both operands)
    code_bf16 = code_ref[...].astype(jnp.bfloat16)
    wc = wc_ref[...]                             # (Dp, Cp) bf16 (codebook.weight, (out,in))
    out = jax.lax.dot_general(
        code_bf16, wc, (((1,), (1,)), ((), ())),
        preferred_element_type=jnp.float32)      # (TM, Dp) f32
    out_ref[...] = out.astype(out_ref.dtype)


def codebook_forward(x, w_head, w_code, gumbel_noise, hardness, tau=1.0):
    """x: (B,S,D); w_head: (C,D); w_code: (D,C); gumbel_noise: (B,S,C); hardness: scalar."""
    B, S, D = x.shape
    C = w_head.shape[0]
    assert w_code.shape == (D, C)
    M = B * S

    Dp = _round_up(max(D, 128), 128)
    Cp = _round_up(max(C, 128), 128)
    TM = _choose_tm(M, Dp, Cp)
    Mp = _round_up(M, TM)

    # bf16 MXU operands; gumbel noise / hardness stay f32 for elementwise math.
    x2 = jnp.pad(x.reshape(M, D).astype(jnp.bfloat16), ((0, Mp - M), (0, Dp - D)))
    g2 = jnp.pad(gumbel_noise.reshape(M, C).astype(jnp.float32),
                 ((0, Mp - M), (0, Cp - C)))
    wh = jnp.pad(jnp.asarray(w_head, jnp.bfloat16), ((0, Cp - C), (0, Dp - D)))
    wc = jnp.pad(jnp.asarray(w_code, jnp.bfloat16), ((0, Dp - D), (0, Cp - C)))
    h = jnp.asarray(hardness, jnp.float32).reshape(1)

    kernel = functools.partial(codebook_kernel,
                               inv_tau=float(1.0 / tau),
                               c_valid=int(C))

    bytes_accessed = (x2.size * 2 + g2.size * 4 + wh.size * 2 + wc.size * 2
                      + Mp * Dp * 4 + 2 * Mp * Cp * 4)

    out, soft_code, code = pl.pallas_call(
        kernel,
        out_shape=(
            jax.ShapeDtypeStruct((Mp, Dp), jnp.float32),
            jax.ShapeDtypeStruct((Mp, Cp), jnp.float32),
            jax.ShapeDtypeStruct((Mp, Cp), jnp.float32),
        ),
        grid=(Mp // TM,),
        in_specs=[
            pl.BlockSpec(memory_space=pltpu.SMEM),              # hardness scalar
            pl.BlockSpec((TM, Dp), lambda i: (i, 0)),            # x tile
            pl.BlockSpec((Cp, Dp), lambda i: (0, 0)),            # head weight (resident)
            pl.BlockSpec((Dp, Cp), lambda i: (0, 0)),            # codebook weight (resident)
            pl.BlockSpec((TM, Cp), lambda i: (i, 0)),            # gumbel tile
        ],
        out_specs=(
            pl.BlockSpec((TM, Dp), lambda i: (i, 0)),
            pl.BlockSpec((TM, Cp), lambda i: (i, 0)),
            pl.BlockSpec((TM, Cp), lambda i: (i, 0)),
        ),
        compiler_params=pltpu.CompilerParams(
            dimension_semantics=("parallel",),
            vmem_limit_bytes=32 * 1024 * 1024,
        ),
        cost_estimate=pl.CostEstimate(
            flops=4 * Mp * Dp * Cp,
            transcendentals=Mp * Cp,
            bytes_accessed=int(bytes_accessed),
        ),
    )(h, x2, wh, wc, g2)

    return (out[:M, :D].reshape(B, S, D),
            soft_code[:M, :C].reshape(B, S, C),
            code[:M, :C].reshape(B, S, C))


if __name__ == "__main__":
    B, S, d_model, codebook_size = 2, 8, 32, 16

    key = jax.random.PRNGKey(0)
    k_x, k_wh, k_wc, k_g = jax.random.split(key, 4)

    # deterministic synthetic parameters (nn.Linear weight layout: (out, in))
    w_head = jax.random.normal(k_wh, (codebook_size, d_model), jnp.float32) * (1.0 / d_model ** 0.5)
    w_code = jax.random.normal(k_wc, (d_model, codebook_size), jnp.float32) * (1.0 / codebook_size ** 0.5)

    x = jax.random.normal(k_x, (B, S, d_model), jnp.float32)
    gumbel_noise = jax.random.gumbel(k_g, (B, S, codebook_size), jnp.float32)

    # hardness > 0 -> gumbel softmax + straight-through blend path
    out, soft_code, code = codebook_forward(x, w_head, w_code, gumbel_noise,
                                            jnp.asarray(0.5, jnp.float32), tau=1.0)
    jax.block_until_ready((out, soft_code, code))

    assert out.shape == (B, S, d_model)
    assert soft_code.shape == (B, S, codebook_size)
    assert code.shape == (B, S, codebook_size)
    assert bool(jnp.all(jnp.isfinite(out)))
    assert bool(jnp.all(jnp.abs(jnp.sum(soft_code, axis=-1) - 1.0) < 1e-3))
    assert bool(jnp.all(jnp.abs(jnp.sum(code, axis=-1) - 1.0) < 1e-3))

    # hardness < 0 -> plain softmax path, code == soft_code
    out2, soft2, code2 = codebook_forward(x, w_head, w_code, gumbel_noise,
                                          jnp.asarray(-1.0, jnp.float32), tau=1.0)
    jax.block_until_ready((out2, soft2, code2))
    assert bool(jnp.all(jnp.abs(jnp.sum(soft2, axis=-1) - 1.0) < 1e-3))
    assert bool(jnp.allclose(soft2, code2))

    print("KERNEL_OK")
</pallas_src>

<mosaic_0001>
module attributes {stable_mosaic.version = 11 : i64} {
  func.func @codebook_kernel(%arg0: i32, %arg1: memref<1xf32, #tpu.memory_space<smem>>, %arg2: memref<16x128xbf16, #tpu.memory_space<vmem>>, %arg3: memref<128x128xbf16, #tpu.memory_space<vmem>>, %arg4: memref<128x128xbf16, #tpu.memory_space<vmem>>, %arg5: memref<16x128xf32, #tpu.memory_space<vmem>>, %arg6: memref<16x128xf32, #tpu.memory_space<vmem>>, %arg7: memref<16x128xf32, #tpu.memory_space<vmem>>, %arg8: memref<16x128xf32, #tpu.memory_space<vmem>>) attributes {dimension_semantics = [#tpu.dimension_semantics<parallel>], iteration_bounds = array<i64: 1>, scalar_prefetch = 0 : i64, scratch_operands = 0 : i64, tpu.core_type = #tpu.core_type<tc>, window_params = [{transform_indices = @transform_0, window_bounds = array<i64: 1>}, {transform_indices = @transform_1, window_bounds = array<i64: 16, 128>}, {pipeline_mode = #tpu.pipeline_mode<synchronous>, transform_indices = @transform_2, window_bounds = array<i64: 128, 128>}, {pipeline_mode = #tpu.pipeline_mode<synchronous>, transform_indices = @transform_3, window_bounds = array<i64: 128, 128>}, {transform_indices = @transform_4, window_bounds = array<i64: 16, 128>}, {transform_indices = @transform_5, window_bounds = array<i64: 16, 128>}, {transform_indices = @transform_6, window_bounds = array<i64: 16, 128>}, {transform_indices = @transform_7, window_bounds = array<i64: 16, 128>}]} {
    %c0 = arith.constant 0 : index
    %0 = memref.load %arg1[%c0] : memref<1xf32, #tpu.memory_space<smem>>
    %c0_0 = arith.constant 0 : index
    %c0_1 = arith.constant 0 : index
    %1 = vector.load %arg2[%c0_0, %c0_1] : memref<16x128xbf16, #tpu.memory_space<vmem>>, vector<16x128xbf16>
    %c0_2 = arith.constant 0 : index
    %c0_3 = arith.constant 0 : index
    %2 = vector.load %arg3[%c0_2, %c0_3] : memref<128x128xbf16, #tpu.memory_space<vmem>>, vector<128x128xbf16>
    %c0_4 = arith.constant 0 : index
    %c0_5 = arith.constant 0 : index
    %3 = vector.load %arg5[%c0_4, %c0_5] : memref<16x128xf32, #tpu.memory_space<vmem>>, vector<16x128xf32>
    %cst = arith.constant dense<0.000000e+00> : vector<16x128xf32>
    %4 = tpu.matmul %1, %2, %cst {dimension_numbers = #tpu.dot_dimension_numbers<[1], [1], [0], [0], [0, 0, 1, 0], [], []>} : vector<16x128xbf16>, vector<128x128xbf16>, vector<16x128xf32> -> vector<16x128xf32>
    %5 = tpu.iota {dimensions = array<i32: 1>} : vector<16x128xi32>
    %c16_i32 = arith.constant 16 : i32
    %6 = vector.broadcast %c16_i32 : i32 to vector<16x128xi32>
    %7 = arith.cmpi slt, %5, %6 : vector<16x128xi32>
    %cst_6 = arith.constant -1.000000e+30 : f32
    %8 = vector.broadcast %cst_6 : f32 to vector<16x128xf32>
    %9 = arith.select %7, %4, %8 : vector<16x128xi1>, vector<16x128xf32>
    %cst_7 = arith.constant 0.000000e+00 : f32
    %10 = arith.cmpf olt, %0, %cst_7 : f32
    %cst_8 = arith.constant 0.000000e+00 : f32
    %cst_9 = arith.constant 1.000000e+00 : f32
    %11 = arith.select %10, %cst_8, %cst_9 : f32
    %12 = vector.broadcast %11 : f32 to vector<16x128xf32>
    %13 = arith.mulf %12, %3 : vector<16x128xf32>
    %14 = arith.addf %9, %13 : vector<16x128xf32>
    %cst_10 = arith.constant 1.000000e+00 : f32
    %15 = vector.broadcast %cst_10 : f32 to vector<16x128xf32>
    %16 = arith.mulf %14, %15 : vector<16x128xf32>
    %cst_11 = arith.constant dense<0xFF800000> : vector<16xf32>
    %17 = vector.multi_reduction <maximumf>, %16, %cst_11 [1] : vector<16x128xf32> to vector<16xf32>
    %18 = vector.shape_cast %17 : vector<16xf32> to vector<16x1xf32>
    %19 = vector.broadcast %18 : vector<16x1xf32> to vector<16x128xf32>
    %20 = arith.subf %16, %19 : vector<16x128xf32>
    %21 = math.exp %20 : vector<16x128xf32>
    %cst_12 = arith.constant dense<0.000000e+00> : vector<16xf32>
    %22 = vector.multi_reduction <add>, %21, %cst_12 [1] : vector<16x128xf32> to vector<16xf32>
    %23 = vector.shape_cast %22 : vector<16xf32> to vector<16x1xf32>
    %24 = tpu.reciprocal %23 : vector<16x1xf32> -> vector<16x1xf32>
    %25 = vector.broadcast %24 : vector<16x1xf32> to vector<16x128xf32>
    %26 = arith.mulf %21, %25 : vector<16x128xf32>
    %c0_13 = arith.constant 0 : index
    %c0_14 = arith.constant 0 : index
    %27 = vector.load %arg7[%c0_13, %c0_14] : memref<16x128xf32, #tpu.memory_space<vmem>>, vector<16x128xf32>
    tpu.vector_store %arg7[%c0_13, %c0_14], %26 {strides = array<i32>} : memref<16x128xf32, #tpu.memory_space<vmem>>, vector<16x128xf32>,
    %cst_15 = arith.constant 0.000000e+00 : f32
    %28 = arith.cmpf ogt, %0, %cst_15 : f32
    %29 = arith.extui %28 : i1 to i32
    %c0_i32 = arith.constant 0 : i32
    %30 = arith.cmpi ne, %29, %c0_i32 : i32
    scf.if %30 {
      %39 = tpu.iota {dimensions = array<i32: 1>} : vector<16x128xi32>
      %cst_25 = arith.constant dense<0xFF800000> : vector<16xf32>
      %40 = vector.multi_reduction <maximumf>, %26, %cst_25 [1] : vector<16x128xf32> to vector<16xf32>
      %41 = vector.shape_cast %40 : vector<16xf32> to vector<16x1xf32>
      %42 = vector.broadcast %41 : vector<16x1xf32> to vector<16x128xf32>
      %43 = arith.cmpf oeq, %26, %42 : vector<16x128xf32>
      %c128_i32 = arith.constant 128 : i32
      %44 = vector.broadcast %c128_i32 : i32 to vector<16x128xi32>
      %45 = arith.select %43, %39, %44 : vector<16x128xi1>, vector<16x128xi32>
      %cst_26 = arith.constant dense<2147483647> : vector<16xi32>
      %46 = vector.multi_reduction <minsi>, %45, %cst_26 [1] : vector<16x128xi32> to vector<16xi32>
      %47 = vector.shape_cast %46 : vector<16xi32> to vector<16x1xi32>
      %48 = vector.broadcast %47 : vector<16x1xi32> to vector<16x128xi32>
      %49 = arith.cmpi eq, %39, %48 : vector<16x128xi32>
      %50 = arith.extui %49 : vector<16x128xi1> to vector<16x128xi32>
      %51 = arith.sitofp %50 : vector<16x128xi32> to vector<16x128xf32>
      %52 = arith.subf %51, %26 : vector<16x128xf32>
      %53 = vector.broadcast %0 : f32 to vector<16x128xf32>
      %54 = arith.mulf %53, %52 : vector<16x128xf32>
      %55 = arith.addf %26, %54 : vector<16x128xf32>
      %c0_27 = arith.constant 0 : index
      %c0_28 = arith.constant 0 : index
      %56 = vector.load %arg8[%c0_27, %c0_28] : memref<16x128xf32, #tpu.memory_space<vmem>>, vector<16x128xf32>
      tpu.vector_store %arg8[%c0_27, %c0_28], %55 {strides = array<i32>} : memref<16x128xf32, #tpu.memory_space<vmem>>, vector<16x128xf32>,
    } else {
    }
    %cst_16 = arith.constant 0.000000e+00 : f32
    %31 = arith.cmpf ole, %0, %cst_16 : f32
    %32 = arith.extui %31 : i1 to i32
    %c0_i32_17 = arith.constant 0 : i32
    %33 = arith.cmpi ne, %32, %c0_i32_17 : i32
    scf.if %33 {
      %c0_25 = arith.constant 0 : index
      %c0_26 = arith.constant 0 : index
      %39 = vector.load %arg8[%c0_25, %c0_26] : memref<16x128xf32, #tpu.memory_space<vmem>>, vector<16x128xf32>
      tpu.vector_store %arg8[%c0_25, %c0_26], %26 {strides = array<i32>} : memref<16x128xf32, #tpu.memory_space<vmem>>, vector<16x128xf32>,
    } else {
    }
    %c0_18 = arith.constant 0 : index
    %c0_19 = arith.constant 0 : index
    %34 = vector.load %arg8[%c0_18, %c0_19] : memref<16x128xf32, #tpu.memory_space<vmem>>, vector<16x128xf32>
    %35 = arith.truncf %34 : vector<16x128xf32> to vector<16x128xbf16>
    %c0_20 = arith.constant 0 : index
    %c0_21 = arith.constant 0 : index
    %36 = vector.load %arg4[%c0_20, %c0_21] : memref<128x128xbf16, #tpu.memory_space<vmem>>, vector<128x128xbf16>
    %cst_22 = arith.constant dense<0.000000e+00> : vector<16x128xf32>
    %37 = tpu.matmul %35, %36, %cst_22 {dimension_numbers = #tpu.dot_dimension_numbers<[1], [1], [0], [0], [0, 0, 1, 0], [], []>} : vector<16x128xbf16>, vector<128x128xbf16>, vector<16x128xf32> -> vector<16x128xf32>
    %c0_23 = arith.constant 0 : index
    %c0_24 = arith.constant 0 : index
    %38 = vector.load %arg6[%c0_23, %c0_24] : memref<16x128xf32, #tpu.memory_space<vmem>>, vector<16x128xf32>
    tpu.vector_store %arg6[%c0_23, %c0_24], %37 {strides = array<i32>} : memref<16x128xf32, #tpu.memory_space<vmem>>, vector<16x128xf32>,
    return
  }
  func.func @transform_0(%arg0: i32) -> i32 {
    %c0_i32 = arith.constant 0 : i32
    %c0_i32_0 = arith.constant 0 : i32
    return %c0_i32 : i32
  }
  func.func @transform_1(%arg0: i32) -> (i32, i32) {
    %c0_i32 = arith.constant 0 : i32
    %c0_i32_0 = arith.constant 0 : i32
    return %arg0, %c0_i32 : i32, i32
  }
  func.func @transform_2(%arg0: i32) -> (i32, i32) {
    %c0_i32 = arith.constant 0 : i32
    %c0_i32_0 = arith.constant 0 : i32
    %c0_i32_1 = arith.constant 0 : i32
    return %c0_i32, %c0_i32_0 : i32, i32
  }
  func.func @transform_3(%arg0: i32) -> (i32, i32) {
    %c0_i32 = arith.constant 0 : i32
    %c0_i32_0 = arith.constant 0 : i32
    %c0_i32_1 = arith.constant 0 : i32
    return %c0_i32, %c0_i32_0 : i32, i32
  }
  func.func @transform_4(%arg0: i32) -> (i32, i32) {
    %c0_i32 = arith.constant 0 : i32
    %c0_i32_0 = arith.constant 0 : i32
    return %arg0, %c0_i32 : i32, i32
  }
  func.func @transform_5(%arg0: i32) -> (i32, i32) {
    %c0_i32 = arith.constant 0 : i32
    %c0_i32_0 = arith.constant 0 : i32
    return %arg0, %c0_i32 : i32, i32
  }
  func.func @transform_6(%arg0: i32) -> (i32, i32) {
    %c0_i32 = arith.constant 0 : i32
    %c0_i32_0 = arith.constant 0 : i32
    return %arg0, %c0_i32 : i32, i32
  }
  func.func @transform_7(%arg0: i32) -> (i32, i32) {
    %c0_i32 = arith.constant 0 : i32
    %c0_i32_0 = arith.constant 0 : i32
    return %arg0, %c0_i32 : i32, i32
  }
}

</mosaic_0001>

<bundles_post_ra>
// kernel: tpu_custom_call.1
= control target key start
LH: loop header
LB: loop body
LE: loop exit
PB: predicated region body
PF: predicated region fallthrough
CT: control target
= control target key end

     0   :  { %14 = vsyncpa [#allocation4], 0  ;;  %s843_s0 = inlined_call_operand.<no memory space> [shape: f32[1], index: 0, kind: input, shape index: {}]   ;;  %s844_s1 = inlined_call_operand.hbm [shape: bf16[16,128], index: 1, kind: input, shape index: {}]   ;;  %s845_s2 = inlined_call_operand.hbm [shape: bf16[128,128], index: 2, kind: input, shape index: {}]   ;;  %s846_s3 = inlined_call_operand.hbm [shape: bf16[128,128], index: 3, kind: input, shape index: {}]   ;;  %s847_s4 = inlined_call_operand.hbm [shape: f32[16,128], index: 4, kind: input, shape index: {}]   ;;  %s848_s5 = inlined_call_operand.hbm [shape: f32[16,128], index: 5, kind: output, shape index: {0}]   ;;  %s849_s6 = inlined_call_operand.hbm [shape: f32[16,128], index: 6, kind: output, shape index: {1}]   ;;  %s850_s7 = inlined_call_operand.hbm [shape: f32[16,128], index: 7, kind: output, shape index: {2}]  }
   0x1   :  { %15 = vsyncpa [#allocation7], 0 }
   0x2   :  { %16 = vsyncpa [#allocation10], 0 }
   0x3   :  { %17 = vsyncpa [#allocation5], 0 }
   0x4   :  { %18 = vsyncpa [#allocation13], 0  ;;  %s717_s24 = smov [#allocation6]   ;;  %s718_s26 = smov [#allocation3]  }
   0x5   :  { %s38_s25 = sshll.u32 %s717_s24, 4  ;;  %s26_s27 = sshll.u32 %s718_s26, 4  ;;  %s39_s25 = int_to_ptr.vmem [resolvable:$true] %s38_s25  ;;  %s27_s27 = int_to_ptr.vmem [resolvable:$true] %s26_s27 }
   0x6   :  { %s575_s28 = scalar_lea.vmem %s39_s25, 1024  ;;  %p580_p1 = scmp.lt.s32.totalorder %s39_s25, %s39_s25 }
   0x7   :  { %p576_p0 = scmp.ne.s32.totalorder %s39_s25, %s575_s28  ;;  %p581_p2 = scmp.lt.s32.totalorder %s575_s28, %s575_s28 }
   0x9   :  { %p582_p3 = por %p581_p2, %p580_p1 }
   0xb   :  { %p583_p4 = pnand %p582_p3, %p576_p0 }
   0xd   :  { %586 = shalt.err (!%p583_p4)
}
   0xe   :  { %s719_s29 = smov 64   ;;  %s720_s30 = smov 4  }
   0xf   :  { %44 = dma.hbm_to_vmem [thread:$0]  %s845_s2, 1024, %s39_s25, [#allocation7], %s719_s29, %s719_s29, %s720_s30  }
  0x10   :  { %s595_s10 = scalar_lea.vmem %s27_s27, 128  ;;  %p600_p6 = scmp.lt.s32.totalorder %s27_s27, %s27_s27 }
  0x11   :  { %p596_p5 = scmp.ne.s32.totalorder %s27_s27, %s595_s10  ;;  %p601_p7 = scmp.lt.s32.totalorder %s595_s10, %s595_s10 }
  0x13   :  { %p602_p8 = por %p601_p7, %p600_p6 }
  0x15   :  { %p603_p9 = pnand %p602_p8, %p596_p5 }
  0x17   :  { %606 = shalt.err (!%p603_p9)
}
  0x18   :  { %32 = dma.hbm_to_vmem [thread:$0]  %s844_s1, 128, %s27_s27, [#allocation4], %s719_s29, %s719_s29, %s720_s30  }
  0x19   :  { %s721_s13 = smov [#allocation8]   ;;  %s722_s15 = smov [#allocation9]  }
  0x1a   :  { %s50_s14 = sshll.u32 %s721_s13, 4  ;;  %s62_s16 = sshll.u32 %s722_s15, 4  ;;  %s51_s14 = int_to_ptr.vmem [resolvable:$true] %s50_s14  ;;  %s63_s16 = int_to_ptr.vmem [resolvable:$true] %s62_s16 }
  0x1b   :  { %s615_s17 = scalar_lea.vmem %s51_s14, 1024  ;;  %p620_p11 = scmp.lt.s32.totalorder %s51_s14, %s51_s14 }
  0x1c   :  { %p616_p10 = scmp.ne.s32.totalorder %s51_s14, %s615_s17  ;;  %p621_p12 = scmp.lt.s32.totalorder %s615_s17, %s615_s17 }
  0x1e   :  { %p622_p13 = por %p621_p12, %p620_p11 }
  0x20   :  { %p623_p0 = pnand %p622_p13, %p616_p10 }
  0x22   :  { %626 = shalt.err (!%p623_p0)
}
  0x23   :  { %56 = dma.hbm_to_vmem [thread:$0]  %s846_s3, 1024, %s51_s14, [#allocation7], %s719_s29, %s719_s29, %s720_s30  }
  0x24   :  { %s635_s19 = scalar_lea.vmem %s63_s16, 256  ;;  %p640_p2 = scmp.lt.s32.totalorder %s63_s16, %s63_s16 }
  0x25   :  { %p636_p1 = scmp.ne.s32.totalorder %s63_s16, %s635_s19  ;;  %p641_p3 = scmp.lt.s32.totalorder %s635_s19, %s635_s19 }
  0x27   :  { %p642_p4 = por %p641_p3, %p640_p2 }
  0x29   :  { %p643_p5 = pnand %p642_p4, %p636_p1 }
  0x2b   :  { %646 = shalt.err (!%p643_p5)
}
  0x2c   :  { %s723_s1 = smov 128   ;;  %s724_s20 = smov 8  }
  0x2d   :  { %68 = dma.hbm_to_vmem [thread:$0]  %s847_s4, 256, %s63_s16, [#allocation10], %s723_s1, %s723_s1, %s724_s20  }
  0x2e   :  { %707 = dma.done.wait [#allocation4], 128  }
  0x2f   :  { %708 = vsyncadd [#allocation4], 4294967168 }
  0x30   :  { %709 = dma.done.wait [#allocation7], 2048  }
  0x31   :  { %710 = vsyncadd [#allocation7], 4294965248 }
  0x32   :  { %711 = dma.done.wait [#allocation10], 256  }
  0x33   :  { %712 = vsyncadd [#allocation10], 4294967040  ;;  %v725_v0 = vmov 0.0   ;;  %vm726_vm0 = vmmov 0   ;;  %v542_v1 = vld [vmem:[#allocation6 + $0x38] sm:$0xff]   ;;  %v543_v2 = vld [vmem:[#allocation6 + $0x30] sm:$0xff]   ;;  %v198_v10 = vlaneseq }
  0x34   :  { %488 = vmatprep.subr.bf16.mxu0 %v725_v0  ;;  %504 = vmatprep.mubr.msk.bf16.mxu0 %vm726_vm0, %v725_v0  ;;  %v544_v3 = vld [vmem:[#allocation6 + $0x28] sm:$0xff]   ;;  %v545_v4 = vld [vmem:[#allocation6 + $0x20] sm:$0xff]   ;;  %v546_v5 = vld [vmem:[#allocation6 + $0x18] sm:$0xff]   ;;  %p203_p6 = scmp.lt.f32.partialorder %s843_s0, 0.0  ;;  %p230_p7 = scmp.gt.f32.partialorder %s843_s0, 0.0 }
  0x35   :  { %489 = vmatpush3.bf16.xpose.msra.mxu0 %v542_v1  ;;  %v547_v6 = vld [vmem:[#allocation6 + $0x10] sm:$0xff]   ;;  %v548_v7 = vld [vmem:[#allocation6 + $0x8] sm:$0xff]   ;;  %v549_v8 = vld [vmem:[#allocation6] sm:$0xff]   ;;  %v799_v11 = vand.u32 127, %v198_v10  ;;  %v727_v1 = vmov (%p230_p7), 0.0  }
  0x36   :  { %490 = vmatprep.subr.bf16.mxu0 %v725_v0  ;;  %v550_v9 = vld [vmem:[#allocation3] sm:$0xff]   ;;  %s204_s23 = scalar_select %p203_p6, 0.0, 1.0  ;;  %v101_v12 = vld [vmem:[#allocation9] sm:$0xff]  ;;  %v102_v15 = vld [vmem:[#allocation9 + $0x8] sm:$0xff] }
  0x37   :  { %vm200_vm1 = vcmp.lt.s32.totalorder %v799_v11, 16 }
  0x38   :  { %v205_v13 = vstv %s204_s23 }
  0x39   :  { %v206_v14 = vmul.f32 %v205_v13, %v101_v12  ;;  %v207_v20 = vmul.f32 %v205_v13, %v102_v15 }
  0x3d   :  { %491 = vmatpush3.bf16.xpose.msra.mxu0 %v543_v2 }
  0x3e   :  { %492 = vmatprep.subr.bf16.mxu0 %v725_v0 }
  0x45   :  { %493 = vmatpush3.bf16.xpose.msra.mxu0 %v544_v3  ;;  %v278_v3 = vstv (%p230_p7), %s843_s0 }
  0x46   :  { %494 = vmatprep.subr.bf16.mxu0 %v725_v0 }
  0x4d   :  { %495 = vmatpush3.bf16.xpose.msra.mxu0 %v545_v4 }
  0x4e   :  { %496 = vmatprep.subr.bf16.mxu0 %v725_v0 }
  0x55   :  { %497 = vmatpush3.bf16.xpose.msra.mxu0 %v546_v5 }
  0x56   :  { %498 = vmatprep.subr.bf16.mxu0 %v725_v0 }
  0x5d   :  { %499 = vmatpush3.bf16.xpose.msra.mxu0 %v547_v6 }
  0x5e   :  { %500 = vmatprep.subr.bf16.mxu0 %v725_v0 }
  0x65   :  { %501 = vmatpush3.bf16.xpose.msra.mxu0 %v548_v7 }
  0x66   :  { %502 = vmatprep.subr.bf16.mxu0 %v725_v0 }
  0x6d   :  { %503 = vmatpush3.bf16.xpose.msra.mxu0 %v549_v8 }
  0x74   :  { %505 = vmatmul.mubr.bf16.vlgmr.msra.gmra.mxu0 %v550_v9 }
 0x134   :  { %v191_v16 = vpop.f32.mrf.mxu0 }
 0x135   :  { %v201_v17 = vsel %vm200_vm1, %v191_v16, -1e+30 }
 0x136   :  { %v506_v18 = vpop.f32.mrf.mxu0  ;;  %v208_v19 = vadd.f32 %v206_v14, %v201_v17 }
 0x138   :  { %210 = vmax.xlane.f32.xlu0 %v208_v19  ;;  %v194_v21 = vpop.f32.mrf.mxu0 }
 0x139   :  { %v202_v22 = vsel %vm200_vm1, %v194_v21, -1e+30 }
 0x13a   :  { %v507_v23 = vpop.f32.mrf.mxu0  ;;  %v209_v24 = vadd.f32 %v207_v20, %v202_v22 }
 0x13c   :  { %212 = vmax.xlane.f32.xlu0 %v209_v24 }
 0x1c1   :  { %v211_v25 = vpop.xlane.xlu0 %210 }
 0x1c2   :  { %v214_v26 = vsub.f32 %v208_v19, %v211_v25 }
 0x1c4   :  { %v216_v27 = vmul.f32 1.442695, %v214_v26 }
 0x1c5   :  { %v213_v28 = vpop.xlane.xlu0 %212 }
 0x1c6   :  { %551 = vpow2.f32 %v216_v27  ;;  %v215_v29 = vsub.f32 %v209_v24, %v213_v28 }
 0x1c8   :  { %v218_v30 = vmul.f32 1.442695, %v215_v29 }
 0x1ca   :  { %553 = vpow2.f32 %v218_v30 }
 0x1d3   :  { %v552_v31 = vpop.eup %551 }
 0x1d4   :  { %220 = vadd.xlane.f32.xlu1 %v552_v31 }
 0x1d7   :  { %v554_v32 = vpop.eup %553 }
 0x1d8   :  { %222 = vadd.xlane.f32.xlu1 %v554_v32 }
 0x25d   :  { %v221_v33 = vpop.xlane.xlu1 %220 }
 0x25e   :  { %555 = vrcp.f32 %v221_v33 }
 0x261   :  { %v223_v34 = vpop.xlane.xlu1 %222 }
 0x262   :  { %557 = vrcp.f32 %v223_v34 }
 0x26b   :  { %v556_v35 = vpop.eup %555 }
 0x26c   :  { %v226_v36 = vmul.f32 %v556_v35, %v552_v31 }
 0x26e   :  { %228 = vst [vmem:[#allocation12] sm:$0xff] %v226_v36  ;;  %233 = sbr.rel (!%p230_p7) target bundleno = 1061 (0x425), region = 41  ;;  %234 = vmax.xlane.f32.xlu0 (%p230_p7), %v226_v36 }
 0x26f   :  { %v558_v37 = vpop.eup %557 }
 0x270   :  { %v227_v38 = vmul.f32 %v558_v37, %v554_v32 }
 0x272   :  { %229 = vst [vmem:[#allocation12 + $0x8] sm:$0xff] %v227_v38  ;;  %236 = vmax.xlane.f32.xlu0 (%p230_p7), %v227_v38 }
 0x2f7   :  { %v235_v39 = vpop.xlane.xlu0 %234 }
 0x2f8   :  { %vm238_vm2 = vcmp.eq.f32.partialorder %v226_v36, %v235_v39 }
 0x2f9   :  { %v240_v40 = vsel %vm238_vm2, %v799_v11, 128 }
 0x2fa   :  { %v243_v41 = vshra.s32 %v240_v40, 16  ;;  %v242_v47 = vand.u32 65535, %v240_v40 }
 0x2fb   :  { %v237_v42 = vpop.xlane.xlu0 %236 }
 0x2fc   :  { %vm239_vm3 = vcmp.eq.f32.partialorder %v227_v38, %v237_v42  ;;  %v245_v43 = vcvt.s32.f32 %v243_v41  ;;  %v244_v48 = vcvt.s32.f32 %v242_v47 }
 0x2fd   :  { %v241_v44 = vsel %vm239_vm3, %v799_v11, 128 }
 0x2fe   :  { %v257_v45 = vshra.s32 %v241_v44, 16  ;;  %246 = vmin.xlane.f32.xlu1 %v245_v43  ;;  %v256_v49 = vand.u32 65535, %v241_v44 }
 0x300   :  { %v259_v46 = vcvt.s32.f32 %v257_v45  ;;  %v258_v52 = vcvt.s32.f32 %v256_v49 }
 0x302   :  { %260 = vmin.xlane.f32.xlu1 %v259_v46 }
 0x387   :  { %v247_v50 = vpop.xlane.xlu1 %246 }
 0x388   :  { %vm248_vm4 = vcmp.eq.f32.partialorder %v245_v43, %v247_v50  ;;  %v253_v55 = vcvt.f32.s32 %v247_v50 }
 0x389   :  { %v249_v51 = vsel %vm248_vm4, %v244_v48, inf }
 0x38a   :  { %250 = vmin.xlane.f32.xlu0 %v249_v51  ;;  %v254_v57 = vshll.u32 %v253_v55, 16 }
 0x38b   :  { %v261_v53 = vpop.xlane.xlu1 %260 }
 0x38c   :  { %vm262_vm5 = vcmp.eq.f32.partialorder %v259_v46, %v261_v53  ;;  %v267_v58 = vcvt.f32.s32 %v261_v53 }
 0x38d   :  { %v263_v54 = vsel %vm262_vm5, %v258_v52, inf }
 0x38e   :  { %264 = vmin.xlane.f32.xlu1 %v263_v54  ;;  %v268_v62 = vshll.u32 %v267_v58, 16 }
 0x413   :  { %v251_v56 = vpop.xlane.xlu0 %250 }
 0x414   :  { %v252_v59 = vcvt.f32.s32 %v251_v56 }
 0x416   :  { %v255_v60 = vadd.s32 %v254_v57, %v252_v59 }
 0x417   :  { %v265_v61 = vpop.xlane.xlu1 %264 }
 0x418   :  { %vm270_vm6 = vcmp.eq.s32.totalorder %v799_v11, %v255_v60  ;;  %v266_v63 = vcvt.f32.s32 %v265_v61 }
 0x419   :  { %v460_v2 = vsel %vm270_vm6, 1.0, %v727_v1 }
 0x41a   :  { %v276_v4 = vsub.f32 %v460_v2, %v226_v36  ;;  %v269_v5 = vadd.s32 %v268_v62, %v266_v63 }
 0x41c   :  { %v279_v6 = vmul.f32 %v278_v3, %v276_v4  ;;  %vm271_vm7 = vcmp.eq.s32.totalorder %v799_v11, %v269_v5 }
 0x41d   :  { %v461_v7 = vsel %vm271_vm7, 1.0, %v727_v1 }
 0x41e   :  { %v281_v8 = vadd.f32 %v279_v6, %v226_v36  ;;  %v277_v9 = vsub.f32 %v461_v7, %v227_v38 }
 0x420   :  { %283 = vst [vmem:[#allocation14] sm:$0xff] %v281_v8  ;;  %v280_v10 = vmul.f32 %v278_v3, %v277_v9 }
 0x422   :  { %v282_v12 = vadd.f32 %v280_v10, %v227_v38 }
 0x424   :  { %284 = vst [vmem:[#allocation14 + $0x8] sm:$0xff] %v282_v12 }
 0x425 PF:  { %p285_p8 = scmp.le.f32.partialorder %s843_s0, 0.0 }
 0x426   :  { %289 = vst [vmem:[#allocation14] sm:$0xff] (%p285_p8), %v226_v36  ;;  %290 = vst [vmem:[#allocation14 + $0x8] sm:$0xff] (%p285_p8), %v227_v38 }
 0x427   :  { %288 = sbr.rel (!%p285_p8) target bundleno = 1068 (0x42c), region = 45 }
 0x42c PF:  { %508 = vmatprep.subr.bf16.mxu1 %v725_v0  ;;  %v559_v13 = vld [vmem:[#allocation8 + $0x38] sm:$0xff]   ;;  %524 = vmatprep.mubr.msk.bf16.mxu1 %vm726_vm0, %v725_v0  ;;  %v560_v11 = vld [vmem:[#allocation8 + $0x30] sm:$0xff]   ;;  %v561_v14 = vld [vmem:[#allocation8 + $0x28] sm:$0xff]   ;;  %s728_s0 = smov [#allocation12]  }
 0x42d   :  { %509 = vmatpush3.bf16.xpose.msra.mxu1 %v559_v13  ;;  %v562_v15 = vld [vmem:[#allocation8 + $0x20] sm:$0xff]   ;;  %v563_v16 = vld [vmem:[#allocation8 + $0x18] sm:$0xff]   ;;  %v564_v17 = vld [vmem:[#allocation8 + $0x10] sm:$0xff]   ;;  %s418_s30 = sshll.u32 %s728_s0, 4  ;;  %s419_s30 = int_to_ptr.vmem [resolvable:$true] %s418_s30 }
 0x42e   :  { %510 = vmatprep.subr.bf16.mxu1 %v725_v0  ;;  %v565_v18 = vld [vmem:[#allocation8 + $0x8] sm:$0xff]   ;;  %v566_v19 = vld [vmem:[#allocation8] sm:$0xff]   ;;  %v291_v20 = vld [vmem:[#allocation14] sm:$0xff]  ;;  %s647_s8 = scalar_lea.vmem %s419_s30, 256  ;;  %p652_p10 = scmp.lt.s32.totalorder %s419_s30, %s419_s30 }
 0x42f   :  { %v292_v21 = vld [vmem:[#allocation14 + $0x8] sm:$0xff]  ;;  %p648_p9 = scmp.ne.s32.totalorder %s419_s30, %s647_s8  ;;  %p653_p11 = scmp.lt.s32.totalorder %s647_s8, %s647_s8 }
 0x430   :  { %v293_v22 = vpack.c.bf16 %v292_v21, %v291_v20 }
 0x431   :  { %p654_p12 = por %p653_p11, %p652_p10 }
 0x433   :  { %p655_p13 = pnand %p654_p12, %p648_p9 }
 0x435   :  { %511 = vmatpush3.bf16.xpose.msra.mxu1 %v560_v11 }
 0x436   :  { %512 = vmatprep.subr.bf16.mxu1 %v725_v0 }
 0x43d   :  { %513 = vmatpush3.bf16.xpose.msra.mxu1 %v561_v14 }
 0x43e   :  { %514 = vmatprep.subr.bf16.mxu1 %v725_v0 }
 0x445   :  { %515 = vmatpush3.bf16.xpose.msra.mxu1 %v562_v15 }
 0x446   :  { %516 = vmatprep.subr.bf16.mxu1 %v725_v0 }
 0x44d   :  { %517 = vmatpush3.bf16.xpose.msra.mxu1 %v563_v16 }
 0x44e   :  { %518 = vmatprep.subr.bf16.mxu1 %v725_v0 }
 0x455   :  { %519 = vmatpush3.bf16.xpose.msra.mxu1 %v564_v17 }
 0x456   :  { %520 = vmatprep.subr.bf16.mxu1 %v725_v0 }
 0x45d   :  { %521 = vmatpush3.bf16.xpose.msra.mxu1 %v565_v18 }
 0x45e   :  { %522 = vmatprep.subr.bf16.mxu1 %v725_v0 }
 0x465   :  { %523 = vmatpush3.bf16.xpose.msra.mxu1 %v566_v19 }
 0x46c   :  { %525 = vmatmul.mubr.bf16.vlgmr.msra.gmra.mxu1 %v293_v22 }
 0x46d   :  { %658 = shalt.err (!%p655_p13)
}
 0x46e   :  { %424 = dma.vmem_to_hbm [thread:$0]  %s419_s30, 256, %s849_s6, [#allocation13], %s723_s1, %s723_s1, %s724_s20  }
 0x46f   :  { %s729_s11 = smov [#allocation14]  }
 0x470   :  { %s430_s12 = sshll.u32 %s729_s11, 4  ;;  %s431_s12 = int_to_ptr.vmem [resolvable:$true] %s430_s12 }
 0x471   :  { %s667_s13 = scalar_lea.vmem %s431_s12, 256  ;;  %p672_p1 = scmp.lt.s32.totalorder %s431_s12, %s431_s12 }
 0x472   :  { %p668_p0 = scmp.ne.s32.totalorder %s431_s12, %s667_s13  ;;  %p673_p2 = scmp.lt.s32.totalorder %s667_s13, %s667_s13 }
 0x474   :  { %p674_p3 = por %p673_p2, %p672_p1 }
 0x476   :  { %p675_p4 = pnand %p674_p3, %p668_p0 }
 0x478   :  { %678 = shalt.err (!%p675_p4)
}
 0x479   :  { %436 = dma.vmem_to_hbm [thread:$0]  %s431_s12, 256, %s850_s7, [#allocation13], %s723_s1, %s723_s1, %s724_s20  }
 0x47a   :  { %s730_s16 = smov [#allocation11]  }
 0x47b   :  { %s406_s6 = sshll.u32 %s730_s16, 4  ;;  %s407_s6 = int_to_ptr.vmem [resolvable:$true] %s406_s6 }
 0x47c   :  { %s687_s17 = scalar_lea.vmem %s407_s6, 256  ;;  %p692_p6 = scmp.lt.s32.totalorder %s407_s6, %s407_s6 }
 0x47d   :  { %p688_p5 = scmp.ne.s32.totalorder %s407_s6, %s687_s17  ;;  %p693_p7 = scmp.lt.s32.totalorder %s687_s17, %s687_s17 }
 0x47f   :  { %p694_p8 = por %p693_p7, %p692_p6 }
 0x481   :  { %p695_p9 = pnand %p694_p8, %p688_p5 }
 0x52c   :  { %v392_v0 = vpop.f32.mrf.mxu1 }
 0x52d   :  { %399 = vst [vmem:[#allocation11] sm:$0xff] %v392_v0 }
 0x52e   :  { %v526_v23 = vpop.f32.mrf.mxu1 }
 0x530   :  { %v395_v24 = vpop.f32.mrf.mxu1 }
 0x531   :  { %400 = vst [vmem:[#allocation11 + $0x8] sm:$0xff] %v395_v24 }
 0x532   :  { %v527_v25 = vpop.f32.mrf.mxu1 }
 0x533   :  { %698 = shalt.err (!%p695_p9)
}
 0x534   :  { %412 = dma.vmem_to_hbm [thread:$0]  %s407_s6, 256, %s848_s5, [#allocation5], %s723_s1, %s723_s1, %s724_s20  }
 0x535   :  { %713 = dma.done.wait [#allocation5], 256  }
 0x536   :  { %714 = vsyncadd [#allocation5], 4294967040 }
 0x537   :  { %715 = dma.done.wait [#allocation13], 512  }
 0x538   :  { %716 = vsyncadd [#allocation13], 4294966784 }
 0x539   :  { %446 = vsyncpa [#allocation4], 1 }
 0x53a   :  { %447 = vsyncpa [#allocation7], 1 }
 0x53b   :  { %448 = vsyncpa [#allocation10], 1 }
 0x53c   :  { %449 = vsyncpa [#allocation5], 1 }
 0x53d   :  { %450 = vsyncpa [#allocation13], 1 }

</bundles_post_ra>
